<compile_context>
chip_gen: v7x
topology: tpu7x:2x2x1
jax: 0.10.0
libtpu: 0.0.40
codegen_flags: <defaults>
</compile_context>

<pallas_src>
from functools import partial

import jax
import jax.numpy as jnp
import numpy as np
from jax.experimental import pallas as pl
from jax.experimental.pallas import tpu as pltpu


def _mdi_kernel(x_ref, w_ref, o_ref, pad_ref, *, T, N, C,
                kernel_sizes, ratios, max_pt, max_pn):
    """All Multi_Dynamic_Inference heads for one batch element.

    x_ref:   (1, T, N, C)         unpadded features
    w_ref:   (H*C, C)             per-head Linear weights, transposed, stacked
                                  and pre-scaled by 1/(KH*KW*len(ratios))
    o_ref:   (1, T*N, C)          summed head outputs
    pad_ref: (Tp, Np, C) f32      VMEM scratch: zero frame + interior copy
    """
    Np = N + 2 * max_pn

    # ---- in-kernel zero padding: frame-only zeroing + interior copy -------
    # Layout: rows [max_pt, max_pt+T) hold the T frames; columns [0, N) hold
    # the N persons and columns [N, Np) are the (right-side only) zero pad.
    # Right-side column padding keeps every store / extraction slice sublane
    # aligned and makes pltpu.roll's circular wrap emulate left/right zero pad.
    if max_pt > 0:
        pad_ref[:max_pt, :, :] = jnp.zeros((max_pt, Np, C), jnp.float32)
        pad_ref[max_pt + T:, :, :] = jnp.zeros((max_pt, Np, C), jnp.float32)
    if max_pn > 0:
        pad_ref[max_pt:max_pt + T, N:, :] = jnp.zeros((T, 2 * max_pn, C),
                                                      jnp.float32)
    pad_ref[max_pt:max_pt + T, :N, :] = x_ref[0].astype(jnp.float32)

    # Load the padded slab ONCE; every tap below is a register-level roll or
    # leading-axis slice of this value.
    slab = pad_ref[...]                                   # (Tp, Np, C)

    # ---- column (N-direction) tap sums, shared across heads per ratio -----
    pair_cache = {}

    def tap_pair(d):
        # roll(+d) + roll(-d): invariant to the roll sign convention, and the
        # wrap-around lands in the zero pad columns => exact ZeroPad2d taps.
        if d not in pair_cache:
            pair_cache[d] = (pltpu.roll(slab, shift=d % Np, axis=1)
                             + pltpu.roll(slab, shift=(Np - d) % Np, axis=1))
        return pair_cache[d]

    half_ws = sorted({(KW - 1) // 2 for _, KW in kernel_sizes})
    col_sums = {}                     # (ratio, half_width) -> (Tp, Np, C)
    for r in ratios:
        acc = slab                    # dx = 0 tap
        prev = 0
        for hw in half_ws:            # incremental widening (3-tap -> 5-tap)
            for k in range(prev + 1, hw + 1):
                acc = acc + tap_pair(k * r)
            col_sums[(r, hw)] = acc
            prev = hw

    # ---- row (T-direction) sums per head, summed over ratios --------------
    pooled = []
    for (KH, KW) in kernel_sizes:
        hh = (KH - 1) // 2
        hw = (KW - 1) // 2
        head_acc = None
        for r in ratios:
            cs = col_sums[(r, hw)]
            racc = cs[max_pt:max_pt + T]                 # dy = 0
            for k in range(1, hh + 1):
                d = k * r
                racc = (racc
                        + cs[max_pt - d:max_pt - d + T]
                        + cs[max_pt + d:max_pt + d + T])
            head_acc = racc if head_acc is None else head_acc + racc
        # Interior columns are a prefix slice (aligned); flatten to (T*N, C).
        pooled.append(head_acc[:, :N, :].reshape(T * N, C))

    # ---- one MXU matmul: heads K-concatenated, head-sum in the accumulator -
    pooled_cat = jnp.concatenate(pooled, axis=-1)        # (T*N, H*C)
    out = jnp.dot(pooled_cat, w_ref[...], preferred_element_type=jnp.float32)
    o_ref[0] = out.astype(o_ref.dtype)


def multi_dynamic_inference(x, weights, kernel_sizes, sampling_ratio, stride=1):
    """x: [B, T, N, C]; weights: list of [C, C] PyTorch Linear weights (out, in)."""
    assert stride == 1, "only the default stride=1 plain-inference path is implemented"
    B, T, N, C = x.shape
    H = len(weights)
    assert H == len(kernel_sizes)
    R = len(sampling_ratio)
    for KH, KW in kernel_sizes:
        assert KH % 2 == 1 and KW % 2 == 1, "only odd kernel sizes supported"

    max_r = max(sampling_ratio)
    max_pt = max((KH - 1) // 2 for KH, _ in kernel_sizes) * max_r
    max_pn = max((KW - 1) // 2 for _, KW in kernel_sizes) * max_r
    Tp, Np = T + 2 * max_pt, N + 2 * max_pn

    # Fold the pooling mean 1/(KH*KW*R) into each head's Linear weight
    # (y = pooled_raw @ (W^T / (KH*KW*R))) and stack heads into one (H*C, C)
    # operand so the head-sum becomes MXU accumulation.
    w_cat = jnp.concatenate(
        [w.T * (1.0 / (KH * KW * R)) for w, (KH, KW) in zip(weights, kernel_sizes)],
        axis=0,
    )

    kern = partial(
        _mdi_kernel, T=T, N=N, C=C,
        kernel_sizes=tuple((int(a), int(b)) for a, b in kernel_sizes),
        ratios=tuple(int(r) for r in sampling_ratio),
        max_pt=max_pt, max_pn=max_pn,
    )

    out = pl.pallas_call(
        kern,
        out_shape=jax.ShapeDtypeStruct((B, T * N, C), x.dtype),
        grid=(B,),
        in_specs=[
            pl.BlockSpec((1, T, N, C), lambda b: (b, 0, 0, 0)),
            pl.BlockSpec((H * C, C), lambda b: (0, 0)),   # grid-constant weights
        ],
        out_specs=pl.BlockSpec((1, T * N, C), lambda b: (b, 0, 0)),
        scratch_shapes=[pltpu.VMEM((Tp, Np, C), jnp.float32)],
        compiler_params=pltpu.CompilerParams(
            dimension_semantics=("parallel",),
            vmem_limit_bytes=32 * 1024 * 1024),
    )(x, w_cat)
    return out.reshape(B, T, N, C)


def reference(x, weights, kernel_sizes, sampling_ratio):
    """Pure-JAX reference of the default-config PyTorch forward."""
    B, T, N, C = x.shape
    total = 0.0
    for w, (KH, KW) in zip(weights, kernel_sizes):
        feats = []
        for r in sampling_ratio:
            pt = (KH - 1) // 2 * r
            pn = (KW - 1) // 2 * r
            xp = jnp.pad(x, ((0, 0), (pt, pt), (pn, pn), (0, 0)))
            acc = 0.0
            for ky in range(KH):
                for kx in range(KW):
                    acc = acc + xp[:, ky * r:ky * r + T, kx * r:kx * r + N, :]
            feats.append(acc / (KH * KW))
        pooled = jnp.mean(jnp.stack(feats, axis=-1), axis=-1)
        total = total + pooled @ w.T
    return total


if __name__ == "__main__":
    # True-f32 matmul precision so the fused kernel and the pure-JAX reference
    # agree to f32 accuracy (applies to both: config is read at trace time).
    jax.config.update("jax_default_matmul_precision", "highest")

    key = jax.random.PRNGKey(0)
    # [B, T, N, NFB] — B=batch, T=frames, N=persons, NFB=in_dim
    B, T, N, C = 2, 8, 8, 32
    num_DIM = 2
    kernel_sizes = [(3, 3), (5, 5)]
    sampling_ratio = [1, 2]

    k_x, *k_ws = jax.random.split(key, 1 + num_DIM)
    x = jax.random.normal(k_x, (B, T, N, C), dtype=jnp.float32)
    # Deterministic kaiming_normal_ init of nn.Linear(in_dim, in_dim, bias=False):
    # std = sqrt(2 / fan_in)
    weights = [jax.random.normal(k, (C, C), dtype=jnp.float32) * jnp.sqrt(2.0 / C)
               for k in k_ws]

    out = multi_dynamic_inference(x, weights, kernel_sizes, sampling_ratio)
    out = jax.block_until_ready(out)

    ref = reference(x, weights, kernel_sizes, sampling_ratio)
    assert out.shape == (B, T, N, C)
    np.testing.assert_allclose(np.asarray(out), np.asarray(ref), rtol=1e-4, atol=1e-4)
    print("KERNEL_OK")
</pallas_src>

<mosaic_0001>
module attributes {stable_mosaic.version = 11 : i64} {
  func.func @_mdi_kernel(%arg0: i32, %arg1: memref<1x8x8x32xf32, #tpu.memory_space<vmem>>, %arg2: memref<64x32xf32, #tpu.memory_space<vmem>>, %arg3: memref<1x64x32xf32, #tpu.memory_space<vmem>>, %arg4: memref<16x16x32xf32, #tpu.memory_space<vmem>>) attributes {dimension_semantics = [#tpu.dimension_semantics<parallel>], iteration_bounds = array<i64: 2>, scalar_prefetch = 0 : i64, scratch_operands = 1 : i64, tpu.core_type = #tpu.core_type<tc>, window_params = [{transform_indices = @transform_0, window_bounds = array<i64: 1, 8, 8, 32>}, {pipeline_mode = #tpu.pipeline_mode<synchronous>, transform_indices = @transform_1, window_bounds = array<i64: 64, 32>}, {transform_indices = @transform_2, window_bounds = array<i64: 1, 64, 32>}]} {
    %cst = arith.constant 0.000000e+00 : f32
    %0 = vector.broadcast %cst : f32 to vector<4x16x32xf32>
    %c0 = arith.constant 0 : index
    %c0_0 = arith.constant 0 : index
    %c0_1 = arith.constant 0 : index
    %1 = vector.load %arg4[%c0, %c0_0, %c0_1] : memref<16x16x32xf32, #tpu.memory_space<vmem>>, vector<4x16x32xf32>
    tpu.vector_store %arg4[%c0, %c0_0, %c0_1], %0 {strides = array<i32>} : memref<16x16x32xf32, #tpu.memory_space<vmem>>, vector<4x16x32xf32>,
    %cst_2 = arith.constant 0.000000e+00 : f32
    %2 = vector.broadcast %cst_2 : f32 to vector<4x16x32xf32>
    %c12 = arith.constant 12 : index
    %c0_3 = arith.constant 0 : index
    %c0_4 = arith.constant 0 : index
    %3 = vector.load %arg4[%c12, %c0_3, %c0_4] : memref<16x16x32xf32, #tpu.memory_space<vmem>>, vector<4x16x32xf32>
    tpu.vector_store %arg4[%c12, %c0_3, %c0_4], %2 {strides = array<i32>} : memref<16x16x32xf32, #tpu.memory_space<vmem>>, vector<4x16x32xf32>,
    %cst_5 = arith.constant 0.000000e+00 : f32
    %4 = vector.broadcast %cst_5 : f32 to vector<8x8x32xf32>
    %c4 = arith.constant 4 : index
    %c8 = arith.constant 8 : index
    %c0_6 = arith.constant 0 : index
    %5 = vector.load %arg4[%c4, %c8, %c0_6] : memref<16x16x32xf32, #tpu.memory_space<vmem>>, vector<8x8x32xf32>
    tpu.vector_store %arg4[%c4, %c8, %c0_6], %4 {strides = array<i32>} : memref<16x16x32xf32, #tpu.memory_space<vmem>>, vector<8x8x32xf32>,
    %c0_7 = arith.constant 0 : index
    %c0_8 = arith.constant 0 : index
    %c0_9 = arith.constant 0 : index
    %c0_10 = arith.constant 0 : index
    %6 = vector.load %arg1[%c0_7, %c0_8, %c0_9, %c0_10] : memref<1x8x8x32xf32, #tpu.memory_space<vmem>>, vector<1x8x8x32xf32>
    %7 = vector.shape_cast %6 : vector<1x8x8x32xf32> to vector<8x8x32xf32>
    %c4_11 = arith.constant 4 : index
    %c0_12 = arith.constant 0 : index
    %c0_13 = arith.constant 0 : index
    %8 = vector.load %arg4[%c4_11, %c0_12, %c0_13] : memref<16x16x32xf32, #tpu.memory_space<vmem>>, vector<8x8x32xf32>
    tpu.vector_store %arg4[%c4_11, %c0_12, %c0_13], %7 {strides = array<i32>} : memref<16x16x32xf32, #tpu.memory_space<vmem>>, vector<8x8x32xf32>,
    %c0_14 = arith.constant 0 : index
    %c0_15 = arith.constant 0 : index
    %c0_16 = arith.constant 0 : index
    %9 = vector.load %arg4[%c0_14, %c0_15, %c0_16] : memref<16x16x32xf32, #tpu.memory_space<vmem>>, vector<16x16x32xf32>
    %c1_i32 = arith.constant 1 : i32
    %10 = tpu.dynamic_rotate %9 by %c1_i32 dim 1 : vector<16x16x32xf32>, i32 -> vector<16x16x32xf32>
    %c15_i32 = arith.constant 15 : i32
    %11 = tpu.dynamic_rotate %9 by %c15_i32 dim 1 : vector<16x16x32xf32>, i32 -> vector<16x16x32xf32>
    %12 = arith.addf %10, %11 : vector<16x16x32xf32>
    %13 = arith.addf %9, %12 : vector<16x16x32xf32>
    %c2_i32 = arith.constant 2 : i32
    %14 = tpu.dynamic_rotate %9 by %c2_i32 dim 1 : vector<16x16x32xf32>, i32 -> vector<16x16x32xf32>
    %c14_i32 = arith.constant 14 : i32
    %15 = tpu.dynamic_rotate %9 by %c14_i32 dim 1 : vector<16x16x32xf32>, i32 -> vector<16x16x32xf32>
    %16 = arith.addf %14, %15 : vector<16x16x32xf32>
    %17 = arith.addf %13, %16 : vector<16x16x32xf32>
    %18 = arith.addf %9, %16 : vector<16x16x32xf32>
    %c4_i32 = arith.constant 4 : i32
    %19 = tpu.dynamic_rotate %9 by %c4_i32 dim 1 : vector<16x16x32xf32>, i32 -> vector<16x16x32xf32>
    %c12_i32 = arith.constant 12 : i32
    %20 = tpu.dynamic_rotate %9 by %c12_i32 dim 1 : vector<16x16x32xf32>, i32 -> vector<16x16x32xf32>
    %21 = arith.addf %19, %20 : vector<16x16x32xf32>
    %22 = arith.addf %18, %21 : vector<16x16x32xf32>
    %23 = vector.extract_strided_slice %13 {offsets = [4, 0, 0], sizes = [8, 16, 32], strides = [1, 1, 1]} : vector<16x16x32xf32> to vector<8x16x32xf32>
    %24 = vector.extract_strided_slice %13 {offsets = [3, 0, 0], sizes = [8, 16, 32], strides = [1, 1, 1]} : vector<16x16x32xf32> to vector<8x16x32xf32>
    %25 = arith.addf %23, %24 : vector<8x16x32xf32>
    %26 = vector.extract_strided_slice %13 {offsets = [5, 0, 0], sizes = [8, 16, 32], strides = [1, 1, 1]} : vector<16x16x32xf32> to vector<8x16x32xf32>
    %27 = arith.addf %25, %26 : vector<8x16x32xf32>
    %28 = vector.extract_strided_slice %18 {offsets = [4, 0, 0], sizes = [8, 16, 32], strides = [1, 1, 1]} : vector<16x16x32xf32> to vector<8x16x32xf32>
    %29 = vector.extract_strided_slice %18 {offsets = [2, 0, 0], sizes = [8, 16, 32], strides = [1, 1, 1]} : vector<16x16x32xf32> to vector<8x16x32xf32>
    %30 = arith.addf %28, %29 : vector<8x16x32xf32>
    %31 = vector.extract_strided_slice %18 {offsets = [6, 0, 0], sizes = [8, 16, 32], strides = [1, 1, 1]} : vector<16x16x32xf32> to vector<8x16x32xf32>
    %32 = arith.addf %30, %31 : vector<8x16x32xf32>
    %33 = arith.addf %27, %32 : vector<8x16x32xf32>
    %34 = vector.extract_strided_slice %33 {offsets = [0, 0, 0], sizes = [8, 8, 32], strides = [1, 1, 1]} : vector<8x16x32xf32> to vector<8x8x32xf32>
    %35 = vector.shape_cast %34 : vector<8x8x32xf32> to vector<64x32xf32>
    %36 = vector.extract_strided_slice %17 {offsets = [4, 0, 0], sizes = [8, 16, 32], strides = [1, 1, 1]} : vector<16x16x32xf32> to vector<8x16x32xf32>
    %37 = vector.extract_strided_slice %17 {offsets = [3, 0, 0], sizes = [8, 16, 32], strides = [1, 1, 1]} : vector<16x16x32xf32> to vector<8x16x32xf32>
    %38 = arith.addf %36, %37 : vector<8x16x32xf32>
    %39 = vector.extract_strided_slice %17 {offsets = [5, 0, 0], sizes = [8, 16, 32], strides = [1, 1, 1]} : vector<16x16x32xf32> to vector<8x16x32xf32>
    %40 = arith.addf %38, %39 : vector<8x16x32xf32>
    %41 = vector.extract_strided_slice %17 {offsets = [2, 0, 0], sizes = [8, 16, 32], strides = [1, 1, 1]} : vector<16x16x32xf32> to vector<8x16x32xf32>
    %42 = arith.addf %40, %41 : vector<8x16x32xf32>
    %43 = vector.extract_strided_slice %17 {offsets = [6, 0, 0], sizes = [8, 16, 32], strides = [1, 1, 1]} : vector<16x16x32xf32> to vector<8x16x32xf32>
    %44 = arith.addf %42, %43 : vector<8x16x32xf32>
    %45 = vector.extract_strided_slice %22 {offsets = [4, 0, 0], sizes = [8, 16, 32], strides = [1, 1, 1]} : vector<16x16x32xf32> to vector<8x16x32xf32>
    %46 = vector.extract_strided_slice %22 {offsets = [2, 0, 0], sizes = [8, 16, 32], strides = [1, 1, 1]} : vector<16x16x32xf32> to vector<8x16x32xf32>
    %47 = arith.addf %45, %46 : vector<8x16x32xf32>
    %48 = vector.extract_strided_slice %22 {offsets = [6, 0, 0], sizes = [8, 16, 32], strides = [1, 1, 1]} : vector<16x16x32xf32> to vector<8x16x32xf32>
    %49 = arith.addf %47, %48 : vector<8x16x32xf32>
    %50 = vector.extract_strided_slice %22 {offsets = [0, 0, 0], sizes = [8, 16, 32], strides = [1, 1, 1]} : vector<16x16x32xf32> to vector<8x16x32xf32>
    %51 = arith.addf %49, %50 : vector<8x16x32xf32>
    %52 = vector.extract_strided_slice %22 {offsets = [8, 0, 0], sizes = [8, 16, 32], strides = [1, 1, 1]} : vector<16x16x32xf32> to vector<8x16x32xf32>
    %53 = arith.addf %51, %52 : vector<8x16x32xf32>
    %54 = arith.addf %44, %53 : vector<8x16x32xf32>
    %55 = vector.extract_strided_slice %54 {offsets = [0, 0, 0], sizes = [8, 8, 32], strides = [1, 1, 1]} : vector<8x16x32xf32> to vector<8x8x32xf32>
    %56 = vector.shape_cast %55 : vector<8x8x32xf32> to vector<64x32xf32>
    %57 = tpu.concatenate %35, %56 in 1 : vector<64x32xf32>, vector<64x32xf32> -> vector<64x64xf32>
    %c0_17 = arith.constant 0 : index
    %c0_18 = arith.constant 0 : index
    %58 = vector.load %arg2[%c0_17, %c0_18] : memref<64x32xf32, #tpu.memory_space<vmem>>, vector<64x32xf32>
    %cst_19 = arith.constant dense<0.000000e+00> : vector<64x32xf32>
    %59 = tpu.matmul %57, %58, %cst_19 {dimension_numbers = #tpu.dot_dimension_numbers<[1], [0], [0], [1], [0, 0, 1, 1], [], []>, precision = #tpu.contract_precision<fp32>} : vector<64x64xf32>, vector<64x32xf32>, vector<64x32xf32> -> vector<64x32xf32>
    %c0_20 = arith.constant 0 : index
    %c0_21 = arith.constant 0 : index
    %c0_22 = arith.constant 0 : index
    %60 = vector.load %arg3[%c0_20, %c0_21, %c0_22] : memref<1x64x32xf32, #tpu.memory_space<vmem>>, vector<1x64x32xf32>
    %61 = vector.shape_cast %60 : vector<1x64x32xf32> to vector<64x32xf32>
    %62 = vector.shape_cast %59 : vector<64x32xf32> to vector<1x64x32xf32>
    tpu.vector_store %arg3[%c0_20, %c0_21, %c0_22], %62 {strides = array<i32>} : memref<1x64x32xf32, #tpu.memory_space<vmem>>, vector<1x64x32xf32>,
    return
  }
  func.func @transform_0(%arg0: i32) -> (i32, i32, i32, i32) {
    %c0_i32 = arith.constant 0 : i32
    %c0_i32_0 = arith.constant 0 : i32
    %c0_i32_1 = arith.constant 0 : i32
    %c0_i32_2 = arith.constant 0 : i32
    return %arg0, %c0_i32, %c0_i32_0, %c0_i32_1 : i32, i32, i32, i32
  }
  func.func @transform_1(%arg0: i32) -> (i32, i32) {
    %c0_i32 = arith.constant 0 : i32
    %c0_i32_0 = arith.constant 0 : i32
    %c0_i32_1 = arith.constant 0 : i32
    return %c0_i32, %c0_i32_0 : i32, i32
  }
  func.func @transform_2(%arg0: i32) -> (i32, i32, i32) {
    %c0_i32 = arith.constant 0 : i32
    %c0_i32_0 = arith.constant 0 : i32
    %c0_i32_1 = arith.constant 0 : i32
    return %arg0, %c0_i32, %c0_i32_0 : i32, i32, i32
  }
}

</mosaic_0001>

<bundles_post_ra>
// kernel: tpu_custom_call.1
= control target key start
LH: loop header
LB: loop body
LE: loop exit
PB: predicated region body
PF: predicated region fallthrough
CT: control target
= control target key end

     0   :  { %7 = vsyncpa [#allocation4], 0  ;;  %s3211_s0 = inlined_call_operand.hbm [shape: f32[2,8,8,32], index: 0, kind: input, shape index: {}]   ;;  %s3212_s1 = inlined_call_operand.vmem [shape: f32[64,32], index: 1, kind: input, shape index: {}]   ;;  %s3213_s2 = inlined_call_operand.vmem [shape: f32[2,64,32], index: 2, kind: output, shape index: {}]  }
   0x1   :  { %9 = vsyncpa [#allocation4 + $0x1], 0  ;;  %s2219_s9 = smov 0   ;;  %s2221_s10 = smov 0  }
   0x2   :  { %s2223_s11 = smov 0   ;;  %s2225_s12 = smov 0  }
   0x3 LB: > { %s2238_s13 = sadd.s32 4294967295, %s2197_s12   ;;  %s2241_s14 = sadd.s32 1, %s2197_s12   ;;  %s2197_s12 = sphi %s2225_s12, %s3220_s12   ;;  %s2193_s11 = sphi %s2223_s11, %s3219_s11   ;;  %s2189_s10 = sphi %s2221_s10, %s3218_s10   ;;  %s2185_s9 = sphi %s2219_s9, %s3217_s9  }
   0x4   : > { %s19_s15 = ssub.s32 %s2197_s12, %s2241_s14  ;;  %s22_s16 = sadd.s32 1, %s2193_s11 }
   0x5   : > { %p20_p0 = scmp.eq.s32.totalorder %s19_s15, 0  ;;  %p29_p1 = scmp.ne.s32.totalorder %s2193_s11, %s2189_s10 }
   0x6   : > { %p30_p2 = scmp.eq.s32.totalorder %s2197_s12, 0  ;;  %p35_p3 = scmp.ne.s32.totalorder %s2189_s10, %s2185_s9 }
   0x7   : > { %s2251_s17 = scalar_select %p20_p0, %s2193_s11, %s22_s16  }
   0x8   : > { %p31_p4 = por %p30_p2, %p29_p1  ;;  %p36_p5 = scmp.eq.s32.totalorder %s2238_s13, 0 }
   0x9   : > { %p2096_p6 = scmp.lt.s32.totalorder %s2197_s12, 2  ;;  %s109_s19 = sand.u32 1, %s2193_s11  }
   0xa   : > { %p2255_p7 = por %p36_p5, %p35_p3  ;;  %s1679_s20 = sshll.u32 %s109_s19, 6 }
   0xb   : > { %s1688_s21 = sshll.u32 %s2197_s12, 10  ;;  %s113_s25 = scalar_lea.vmem [#allocation3], %s1679_s20 }
   0xc   : > { %s2264_s24 = scalar_lea.hbm %s3211_s0, %s1688_s21  ;;  %s120_s26 = sshll.u32 %s113_s25, 4  ;;  %s2266_s26 = int_to_ptr.vmem [resolvable:$true] %s120_s26 }
   0xd   : > { %p2268_p8 = pnand %p2096_p6, %p31_p4  ;;  %s2273_s28 = scalar_lea.sflag [#allocation4], %s109_s19 }
   0xe   : > { %s2133_s29 = scalar_lea.hbm %s2264_s24, 1024  ;;  %s2138_s4 = scalar_lea.hbm %s3211_s0, 2048 }
   0xf   : > { %p2134_p10 = scmp.ne.s32.totalorder %s2264_s24, %s2133_s29  ;;  %p2135_p11 = pneg %p2268_p8 }
  0x10   : > { %p2139_p0 = scmp.lt.u32.totalorder %s2264_s24, %s3211_s0  ;;  %p2140_p1 = scmp.lt.u32.totalorder %s2138_s4, %s2133_s29 }
  0x11   : > { %p2136_p12 = pnand %p2135_p11, %p2134_p10  ;;  %p2142_p3 = scmp.lt.u32.totalorder %s2133_s29, %s2264_s24 }
  0x12   : > { %p2141_p2 = por %p2140_p1, %p2139_p0 }
  0x13   : > { %p2137_p13 = pneg %p2136_p12 }
  0x14   : > { %p2143_p4 = por %p2142_p3, %p2141_p2 }
  0x16   : > { %p2144_p5 = pnand %p2143_p4, %p2137_p13 }
  0x18   : > { %2147 = shalt.err (!%p2144_p5)
}
  0x19   : > { %s2148_s7 = scalar_lea.vmem %s2266_s26, 1024  ;;  %s2199_s8 = smov [#allocation3]  }
  0x1a   : > { %p2149_p6 = scmp.ne.s32.totalorder %s2266_s26, %s2148_s7  ;;  %s2153_s9 = sshll.u32 %s2199_s8, 4  ;;  %s2154_s9 = int_to_ptr.vmem [resolvable:$false] %s2153_s9 }
  0x1b   : > { %s2155_s15 = scalar_lea.vmem %s2154_s9, 2048  ;;  %p2156_p9 = scmp.lt.s32.totalorder %s2266_s26, %s2154_s9 }
  0x1c   : > { %p2151_p10 = pnand %p2149_p6, %p2135_p11  ;;  %p2157_p0 = scmp.lt.s32.totalorder %s2155_s15, %s2148_s7 }
  0x1e   : > { %p2152_p12 = pneg %p2151_p10  ;;  %p2158_p1 = por %p2157_p0, %p2156_p9 }
  0x20   : > { %p2159_p2 = pnand %p2158_p1, %p2152_p12 }
  0x22   : > { %2162 = shalt.err (!%p2159_p2)
}
  0x23   : > { %s2200_s16 = smov 128   ;;  %s2201_s19 = smov 8  }
  0x24   : > { %2095 = dma.hbm_to_vmem [thread:$0]  (!%p2268_p8), %s2264_s24, 1024, %s2266_s26, %s2273_s28, %s2200_s16, %s2200_s16, %s2201_s19  }
  0x25   : > { %p128_p11 = scmp.lt.s32.totalorder %s2197_s12, 3  ;;  %p3216_p13 = scmp.ge.s32.totalorder %s2197_s12, 1 }
  0x27   : > { %p129_p3 = pnand %p3216_p13, %p128_p11 }
  0x28   : > { %s134_s20 = sand.u32 (!%p129_p3), 1, %s2189_s10  }
  0x29   : > { %132 = sbr.rel (%p129_p3) target bundleno = 547 (0x223), region = 28  ;;  %s1683_s21 = sshll.u32 (!%p129_p3), %s134_s20, 6 }
  0x2a   : > { %s135_s22 = scalar_lea.sflag (!%p129_p3), [#allocation4], %s134_s20  ;;  %s2305_s23 = scalar_lea.vmem (!%p129_p3), [#allocation3], %s1683_s21 }
  0x30   : > { %2180 = dma.done.wait (%p2255_p7), %s135_s22, 1024  }
  0x31   : > { %2182 = vsyncadd (%p2255_p7), %s135_s22, 4294966272  ;;  %vm164_vm0 = vcmask 261120   ;;  %v2202_v0 = vmov 0.0   ;;  %v263_v1 = vlaneseq  ;;  %v191_v3 = vld [vmem:[%s2305_s23] sm:$0xff]  ;;  %v192_v4 = vld [vmem:[%s2305_s23 + $0x8] sm:$0xff]  ;;  %s2203_s12 = smov 32  }
  0x32   : > { %169 = vst.msk [vmem:[#allocation2 + $0x20] sm:$0xff] %vm164_vm0, %v2202_v0  ;;  %170 = vst.msk [vmem:[#allocation2 + $0x28] sm:$0xff] %vm164_vm0, %v2202_v0  ;;  %v193_v5 = vld [vmem:[%s2305_s23 + $0x10] sm:$0xff]  ;;  %v194_v6 = vld [vmem:[%s2305_s23 + $0x18] sm:$0xff]  ;;  %vm738_vm6 = vcmask 523264   ;;  %p159_p7 = scmp.lt.s32.totalorder %s2238_s13, 1 }
  0x33   : > { %183 = vst.msk [vmem:[#allocation2 + $0x48] sm:$0xff] %vm164_vm0, %v2202_v0  ;;  %184 = vst.msk [vmem:[#allocation2 + $0x58] sm:$0xff] %vm164_vm0, %v2202_v0  ;;  %v2335_v2 = vshrl.u32 %v263_v1, 7  ;;  %v195_v7 = vld [vmem:[%s2305_s23 + $0x20] sm:$0xff]  ;;  %v197_v8 = vld [vmem:[%s2305_s23 + $0x30] sm:$0xff] }
  0x34   : > { %185 = vst.msk [vmem:[#allocation2 + $0x68] sm:$0xff] %vm164_vm0, %v2202_v0  ;;  %186 = vst.msk [vmem:[#allocation2 + $0x78] sm:$0xff] %vm164_vm0, %v2202_v0  ;;  %v196_v36 = vld [vmem:[%s2305_s23 + $0x28] sm:$0xff]  ;;  %v198_v37 = vld [vmem:[%s2305_s23 + $0x38] sm:$0xff]  ;;  %s3222_s13 = smov (!%p159_p7, %s2238_s13), 1 }
  0x35   : > { %187 = vst.msk [vmem:[#allocation2 + $0x88] sm:$0xff] %vm164_vm0, %v2202_v0  ;;  %189 = vst.msk [vmem:[#allocation2 + $0xa8] sm:$0xff] %vm164_vm0, %v2202_v0  ;;  %vm265_vm1 = vcmp.lt.s32.totalorder %v2335_v2, 1  ;;  %vm302_vm2 = vcmp.lt.s32.totalorder %v2335_v2, 7  ;;  %vm371_vm3 = vcmp.lt.s32.totalorder %v2335_v2, 2  ;;  %vm420_vm4 = vcmp.lt.s32.totalorder %v2335_v2, 6 }
  0x36   : > { %165 = vst.msk [vmem:[#allocation2] sm:$0xff] %vm164_vm0, %v2202_v0  ;;  %166 = vst.msk [vmem:[#allocation2 + $0x8] sm:$0xff] %vm164_vm0, %v2202_v0  ;;  %vm513_vm5 = vcmp.lt.s32.totalorder %v2335_v2, 4  ;;  %s1689_s16 = sshll.u32 %s3222_s13, 6 }
  0x37   : > { %167 = vst.msk [vmem:[#allocation2 + $0x10] sm:$0xff] %vm164_vm0, %v2202_v0  ;;  %168 = vst.msk [vmem:[#allocation2 + $0x18] sm:$0xff] %vm164_vm0, %v2202_v0  ;;  %s163_s21 = scalar_lea.vmem %s3213_s2, %s1689_s16 }
  0x38   : > { %171 = vst.msk [vmem:[#allocation2 + $0x30] sm:$0xff] %vm164_vm0, %v2202_v0  ;;  %172 = vst.msk [vmem:[#allocation2 + $0x38] sm:$0xff] %vm164_vm0, %v2202_v0 }
  0x39   : > { %174 = vst.msk [vmem:[#allocation2 + $0xc0] sm:$0xff] %vm164_vm0, %v2202_v0  ;;  %175 = vst.msk [vmem:[#allocation2 + $0xc8] sm:$0xff] %vm164_vm0, %v2202_v0  ;;  %v2349_v9 = vld [vmem:[#allocation2 + $0x20] sm:$0xff]  ;;  %v2351_v10 = vld [vmem:[#allocation2 + $0x28] sm:$0xff] }
  0x3a   : > { %176 = vst.msk [vmem:[#allocation2 + $0xd0] sm:$0xff] %vm164_vm0, %v2202_v0  ;;  %177 = vst.msk [vmem:[#allocation2 + $0xd8] sm:$0xff] %vm164_vm0, %v2202_v0  ;;  %v2353_v11 = vld [vmem:[#allocation2 + $0x48] sm:$0xff]  ;;  %v2358_v12 = vld [vmem:[#allocation2 + $0x58] sm:$0xff]  ;;  %v341_v17 = vrot.slane %v2349_v9, 6  ;;  %v357_v30 = vrot.slane %v2351_v10, 6 }
  0x3b   : > { %178 = vst.msk [vmem:[#allocation2 + $0xe0] sm:$0xff] %vm164_vm0, %v2202_v0  ;;  %179 = vst.msk [vmem:[#allocation2 + $0xe8] sm:$0xff] %vm164_vm0, %v2202_v0  ;;  %v2360_v13 = vld [vmem:[#allocation2 + $0x68] sm:$0xff]  ;;  %v2362_v14 = vld [vmem:[#allocation2 + $0x78] sm:$0xff]  ;;  %v253_v15 = vrot.slane %v2353_v11, 7  ;;  %v292_v16 = vrot.slane %v2353_v11, 1 }
  0x3c   : > { %180 = vst.msk [vmem:[#allocation2 + $0xf0] sm:$0xff] %vm164_vm0, %v2202_v0  ;;  %181 = vst.msk [vmem:[#allocation2 + $0xf8] sm:$0xff] %vm164_vm0, %v2202_v0  ;;  %v2367_v18 = vld [vmem:[#allocation2 + $0x88] sm:$0xff]  ;;  %v254_v20 = vrot.slane %v2358_v12, 7  ;;  %v255_v21 = vrot.slane %v2360_v13, 7  ;;  %v256_v22 = vrot.slane %v2362_v14, 7  ;;  %v2411_v50 = vsel %vm371_vm3, %v357_v30, %v341_v17 }
  0x3d   : > { %188 = vst.msk [vmem:[#allocation2 + $0x98] sm:$0xff] %vm164_vm0, %v2202_v0  ;;  %190 = vst.msk [vmem:[#allocation2 + $0xb8] sm:$0xff] %vm164_vm0, %v2202_v0  ;;  %v2369_v19 = vld [vmem:[#allocation2 + $0xa8] sm:$0xff]  ;;  %v293_v23 = vrot.slane %v2358_v12, 1  ;;  %v257_v24 = vrot.slane %v2367_v18, 7  ;;  %v294_v26 = vrot.slane %v2360_v13, 1 }
  0x3e   : > { %199 = vst.msk [vmem:[#allocation2 + $0x40] sm:$0xff] %vm164_vm0, %v191_v3  ;;  %200 = vst.msk [vmem:[#allocation2 + $0x50] sm:$0xff] %vm164_vm0, %v192_v4  ;;  %v259_v25 = vrot.slane %v2369_v19, 7  ;;  %v295_v27 = vrot.slane %v2362_v14, 1  ;;  %v296_v28 = vrot.slane %v2367_v18, 1  ;;  %v298_v29 = vrot.slane %v2369_v19, 1 }
  0x3f   : > { %201 = vst.msk [vmem:[#allocation2 + $0x60] sm:$0xff] %vm164_vm0, %v193_v5  ;;  %202 = vst.msk [vmem:[#allocation2 + $0x70] sm:$0xff] %vm164_vm0, %v194_v6  ;;  %v359_v31 = vrot.slane %v2353_v11, 6  ;;  %v360_v32 = vrot.slane %v2358_v12, 6  ;;  %v361_v33 = vrot.slane %v2360_v13, 6  ;;  %v362_v34 = vrot.slane %v2362_v14, 6 }
  0x40   : > { %203 = vst.msk [vmem:[#allocation2 + $0x80] sm:$0xff] %vm164_vm0, %v195_v7  ;;  %205 = vst.msk [vmem:[#allocation2 + $0xa0] sm:$0xff] %vm164_vm0, %v197_v8  ;;  %v363_v35 = vrot.slane %v2367_v18, 6  ;;  %v365_v41 = vrot.slane %v2369_v19, 6  ;;  %v390_v42 = vrot.slane %v2349_v9, 2  ;;  %v406_v43 = vrot.slane %v2351_v10, 2 }
  0x41   : > { %204 = vst.msk [vmem:[#allocation2 + $0x90] sm:$0xff] %vm164_vm0, %v196_v36  ;;  %206 = vst.msk [vmem:[#allocation2 + $0xb0] sm:$0xff] %vm164_vm0, %v198_v37 }
  0x45   : > { %v2389_v38 = vld [vmem:[#allocation2 + $0x40] sm:$0xff]  ;;  %v2391_v39 = vld [vmem:[#allocation2 + $0x50] sm:$0xff] }
  0x46   : > { %v2393_v40 = vld [vmem:[#allocation2 + $0x60] sm:$0xff]  ;;  %v2400_v44 = vld [vmem:[#allocation2 + $0x70] sm:$0xff]  ;;  %v241_v47 = vrot.slane %v2389_v38, 7  ;;  %v242_v48 = vrot.slane %v2391_v39, 7  ;;  %v280_v54 = vrot.slane %v2389_v38, 1  ;;  %v281_v58 = vrot.slane %v2391_v39, 1 }
  0x47   : > { %v2402_v45 = vld [vmem:[#allocation2 + $0x80] sm:$0xff]  ;;  %v243_v49 = vrot.slane %v2393_v40, 7  ;;  %v244_v51 = vrot.slane %v2400_v44, 7  ;;  %v282_v62 = vrot.slane %v2393_v40, 1  ;;  %v283_v63 = vrot.slane %v2400_v44, 1 }
  0x48   : > { %v2404_v46 = vld [vmem:[#allocation2 + $0xa0] sm:$0xff]  ;;  %v245_v52 = vrot.slane %v2402_v45, 7  ;;  %v268_v55 = vsel %vm265_vm1, %v253_v15, %v241_v47  ;;  %v269_v56 = vsel %vm265_vm1, %v254_v20, %v242_v48  ;;  %v284_v0 = vrot.slane %v2402_v45, 1 }
  0x49   : > { %v247_v53 = vrot.slane %v2404_v46, 7  ;;  %v270_v57 = vsel %vm265_vm1, %v255_v21, %v243_v49  ;;  %v271_v59 = vsel %vm265_vm1, %v256_v22, %v244_v51  ;;  %v286_v1 = vrot.slane %v2404_v46, 1 }
  0x4a   : > { %v272_v60 = vsel %vm265_vm1, %v257_v24, %v245_v52  ;;  %v305_v3 = vsel %vm302_vm2, %v280_v54, %v292_v16  ;;  %v306_v4 = vsel %vm302_vm2, %v281_v58, %v293_v23  ;;  %v307_v5 = vsel %vm302_vm2, %v282_v62, %v294_v26 }
  0x4b   : > { %v274_v61 = vsel %vm265_vm1, %v259_v25, %v247_v53  ;;  %v317_v6 = vadd.f32 %v305_v3, %v268_v55  ;;  %v343_v7 = vrot.slane %v2389_v38, 6  ;;  %v308_v8 = vsel %vm302_vm2, %v283_v63, %v295_v27 }
  0x4c   : > { %v309_v15 = vsel %vm302_vm2, %v284_v0, %v296_v28  ;;  %v311_v16 = vsel %vm302_vm2, %v286_v1, %v298_v29  ;;  %v318_v17 = vadd.f32 %v306_v4, %v269_v56  ;;  %v319_v20 = vadd.f32 %v307_v5, %v270_v57 }
  0x4d   : > { %v320_v21 = vadd.f32 %v308_v8, %v271_v59  ;;  %v321_v22 = vadd.f32 %v309_v15, %v272_v60  ;;  %v323_v23 = vadd.f32 %v311_v16, %v274_v61  ;;  %v2449_v24 = vadd.f32 %v317_v6, %v2389_v38 }
  0x4e   : > { %v2452_v25 = vadd.f32 %v318_v17, %v2391_v39  ;;  %v344_v26 = vrot.slane %v2391_v39, 6  ;;  %v345_v27 = vrot.slane %v2393_v40, 6  ;;  %v2457_v28 = vadd.f32 %v319_v20, %v2393_v40 }
  0x4f   : > { %v2460_v29 = vadd.f32 %v320_v21, %v2400_v44  ;;  %v2463_v30 = vadd.f32 %v321_v22, %v2402_v45  ;;  %v2466_v36 = vadd.f32 %v323_v23, %v2404_v46  ;;  %v346_v37 = vrot.slane %v2400_v44, 6 }
  0x50   : > { %v347_v47 = vrot.slane %v2402_v45, 6  ;;  %v349_v48 = vrot.slane %v2404_v46, 6  ;;  %v376_v49 = vsel %vm371_vm3, %v359_v31, %v343_v7  ;;  %v377_v51 = vsel %vm371_vm3, %v360_v32, %v344_v26 }
  0x51   : > { %v378_v52 = vsel %vm371_vm3, %v361_v33, %v345_v27  ;;  %v392_v53 = vrot.slane %v2389_v38, 2  ;;  %v393_v54 = vrot.slane %v2391_v39, 2  ;;  %v379_v55 = vsel %vm371_vm3, %v362_v34, %v346_v37 }
  0x52   : > { %v380_v31 = vsel %vm371_vm3, %v363_v35, %v347_v47  ;;  %v382_v32 = vsel %vm371_vm3, %v365_v41, %v349_v48  ;;  %v394_v56 = vrot.slane %v2393_v40, 2  ;;  %v395_v33 = vrot.slane %v2400_v44, 2 }
  0x53   : > { %v396_v57 = vrot.slane %v2402_v45, 2  ;;  %v398_v58 = vrot.slane %v2404_v46, 2  ;;  %v408_v59 = vrot.slane %v2353_v11, 2  ;;  %v409_v34 = vrot.slane %v2358_v12, 2 }
  0x54   : > { %v410_v60 = vrot.slane %v2360_v13, 2  ;;  %v411_v61 = vrot.slane %v2362_v14, 2  ;;  %v412_v35 = vrot.slane %v2367_v18, 2  ;;  %v414_v41 = vrot.slane %v2369_v19, 2 }
  0x55   : > { %v423_v62 = vsel %vm420_vm4, %v390_v42, %v406_v43  ;;  %v425_v63 = vsel %vm420_vm4, %v392_v53, %v408_v59  ;;  %v483_v0 = vrot.slane %v2349_v9, 4  ;;  %v426_v1 = vsel %vm420_vm4, %v393_v54, %v409_v34 }
  0x56   : > { %v427_v3 = vsel %vm420_vm4, %v394_v56, %v410_v60  ;;  %v428_v4 = vsel %vm420_vm4, %v395_v33, %v411_v61  ;;  %v429_v5 = vsel %vm420_vm4, %v396_v57, %v412_v35  ;;  %v431_v42 = vsel %vm420_vm4, %v398_v58, %v414_v41  ;;  %v2599_v61 = vld [vmem:[#allocation2 + $0x38] sm:$0xff] }
  0x57   : > { %v2526_v43 = vadd.f32 %v423_v62, %v2411_v50  ;;  %v441_v6 = vadd.f32 %v425_v63, %v376_v49  ;;  %v2528_v7 = vadd.f32 %v426_v1, %v377_v51  ;;  %v443_v8 = vadd.f32 %v427_v3, %v378_v52  ;;  %v2568_v52 = vld [vmem:[#allocation2 + $0x30] sm:$0xff] }
  0x58   : > { %v444_v15 = vadd.f32 %v428_v4, %v379_v55  ;;  %v445_v16 = vadd.f32 %v429_v5, %v380_v31  ;;  %v447_v17 = vadd.f32 %v431_v42, %v382_v32  ;;  %v485_v53 = vrot.slane %v2389_v38, 4 }
  0x59   : > { %v2531_v20 = vadd.f32 %v441_v6, %v2449_v24  ;;  %v2535_v21 = vadd.f32 %v2528_v7, %v2452_v25  ;;  %v2539_v22 = vadd.f32 %v2526_v43, %v2349_v9  ;;  %v2542_v50 = vadd.f32 %v441_v6, %v2389_v38 }
  0x5a   : > { %v2545_v23 = vadd.f32 %v443_v8, %v2457_v28  ;;  %v2548_v26 = vadd.f32 %v444_v15, %v2460_v29  ;;  %v2551_v27 = vadd.f32 %v445_v16, %v2463_v30  ;;  %v2554_v37 = vadd.f32 %v447_v17, %v2466_v36 }
  0x5b   : > { %v2557_v47 = vadd.f32 %v443_v8, %v2393_v40  ;;  %v2560_v48 = vadd.f32 %v444_v15, %v2400_v44  ;;  %v2563_v49 = vadd.f32 %v445_v16, %v2402_v45  ;;  %v2566_v51 = vadd.f32 %v447_v17, %v2404_v46 }
  0x5c   : > { %v487_v54 = vrot.slane %v2393_v40, 4  ;;  %v489_v55 = vrot.slane %v2402_v45, 4  ;;  %v491_v31 = vrot.slane %v2404_v46, 4  ;;  %v499_v32 = vrot.slane %v2351_v10, 4 }
  0x5d   : > { %v501_v56 = vrot.slane %v2353_v11, 4  ;;  %v503_v33 = vrot.slane %v2360_v13, 4  ;;  %v505_v57 = vrot.slane %v2367_v18, 4  ;;  %v507_v58 = vrot.slane %v2369_v19, 4 }
  0x5e   : > { %v620_v59 = vadd.f32 %v2545_v23, %v2535_v21  ;;  %v239_v38 = vrot.slane %v2349_v9, 7  ;;  %v240_v40 = vrot.slane %v2568_v52, 7  ;;  %v516_v45 = vsel %vm513_vm5, %v499_v32, %v483_v0 }
  0x5f   : > { %v518_v46 = vsel %vm513_vm5, %v501_v56, %v485_v53  ;;  %v520_v11 = vsel %vm513_vm5, %v503_v33, %v487_v54  ;;  %v522_v13 = vsel %vm513_vm5, %v505_v57, %v489_v55  ;;  %v524_v18 = vsel %vm513_vm5, %v507_v58, %v491_v31 }
  0x60   : > { %v532_v19 = vsel %vm513_vm5, %v483_v0, %v499_v32  ;;  %v534_v34 = vsel %vm513_vm5, %v485_v53, %v501_v56  ;;  %v536_v60 = vsel %vm513_vm5, %v487_v54, %v503_v33  ;;  %v538_v35 = vsel %vm513_vm5, %v489_v55, %v505_v57  ;;  %v207_v54 = vld [vmem:[#allocation2] sm:$0xff]  ;;  %v208_v55 = vld [vmem:[#allocation2 + $0x8] sm:$0xff] }
  0x61   : > { %v540_v41 = vsel %vm513_vm5, %v491_v31, %v507_v58  ;;  %v548_v62 = vadd.f32 %v532_v19, %v516_v45  ;;  %v550_v63 = vadd.f32 %v534_v34, %v518_v46  ;;  %v552_v1 = vadd.f32 %v536_v60, %v520_v11 }
  0x62   : > { %v554_v3 = vadd.f32 %v538_v35, %v522_v13  ;;  %v556_v4 = vadd.f32 %v540_v41, %v524_v18  ;;  %v628_v0 = vadd.f32 %v620_v59, %v2548_v26  ;;  %v251_v6 = vrot.slane %v2351_v10, 7 }
  0x63   : > { %v564_v5 = vadd.f32 %v548_v62, %v2539_v22  ;;  %v2608_v42 = vadd.f32 %v550_v63, %v2542_v50  ;;  %v252_v8 = vrot.slane %v2599_v61, 7  ;;  %v2613_v15 = vadd.f32 %v552_v1, %v2557_v47 }
  0x64   : > { %v2616_v16 = vadd.f32 %v554_v3, %v2563_v49  ;;  %v2619_v17 = vadd.f32 %v556_v4, %v2566_v51  ;;  %v636_v53 = vadd.f32 %v628_v0, %v2531_v20  ;;  %v266_v31 = vsel %vm265_vm1, %v251_v6, %v239_v38 }
  0x65   : > { %v267_v32 = vsel %vm265_vm1, %v252_v8, %v240_v40  ;;  %v278_v56 = vrot.slane %v2349_v9, 1  ;;  %v279_v33 = vrot.slane %v2568_v52, 1  ;;  %v652_v58 = vadd.f32 %v2613_v15, %v2608_v42 }
  0x66   : > { %v644_v57 = vadd.f32 %v636_v53, %v2551_v27  ;;  %v290_v59 = vrot.slane %v2351_v10, 1  ;;  %v291_v45 = vrot.slane %v2599_v61, 1  ;;  %v339_v46 = vrot.slane %v207_v54, 6 }
  0x67   : > { %v342_v11 = vrot.slane %v2568_v52, 6  ;;  %v355_v38 = vrot.slane %v208_v55, 6  ;;  %v358_v13 = vrot.slane %v2599_v61, 6  ;;  %v660_v40 = vadd.f32 %v652_v58, %v2616_v16 }
  0x68   : > { %v303_v18 = vsel %vm302_vm2, %v278_v56, %v290_v59  ;;  %v304_v19 = vsel %vm302_vm2, %v279_v33, %v291_v45  ;;  %v388_v34 = vrot.slane %v207_v54, 2  ;;  %v391_v63 = vrot.slane %v2568_v52, 2  ;;  %v2659_v45 = vld [vmem:[#allocation2 + $0x90] sm:$0xff] }
  0x69   : > { %v315_v60 = vadd.f32 %v303_v18, %v266_v31  ;;  %v316_v35 = vadd.f32 %v304_v19, %v267_v32  ;;  %v372_v10 = vsel %vm371_vm3, %v355_v38, %v339_v46  ;;  %v375_v41 = vsel %vm371_vm3, %v358_v13, %v342_v11  ;;  %v2666_v13 = vld [vmem:[#allocation2 + $0x98] sm:$0xff] }
  0x6a   : > { %v668_v62 = vadd.f32 %v660_v40, %v564_v5  ;;  %v404_v1 = vrot.slane %v208_v55, 2  ;;  %v407_v3 = vrot.slane %v2599_v61, 2  ;;  %v481_v6 = vrot.slane %v207_v54, 4  ;;  %v2672_v19 = vld [vmem:[#allocation2 + $0xb8] sm:$0xff] }
  0x6b   : > { %v327_v4 = vadd.f32 %v315_v60, %v2349_v9  ;;  %v2648_v0 = vadd.f32 %v316_v35, %v2568_v52  ;;  %v497_v8 = vrot.slane %v208_v55, 4  ;;  %v650_v56 = vadd.f32 %v2608_v42, %v564_v5  ;;  %v2661_v55 = vld [vmem:[#allocation2 + $0xb0] sm:$0xff] }
  0x6c   : > { %v676_v53 = vadd.f32 %v668_v62, %v2619_v17  ;;  %v421_v31 = vsel %vm420_vm4, %v388_v34, %v404_v1  ;;  %v424_v32 = vsel %vm420_vm4, %v391_v63, %v407_v3  ;;  %v246_v5 = vrot.slane %v2659_v45, 7 }
  0x6d   : > { %v437_v33 = vadd.f32 %v421_v31, %v372_v10  ;;  %v440_v58 = vadd.f32 %v424_v32, %v375_v41  ;;  %v453_v59 = vadd.f32 %v2526_v43, %v327_v4  ;;  %v514_v9 = vsel %vm513_vm5, %v497_v8, %v481_v6 }
  0x6e   : > { %v684_v46 = vadd.f32 %v676_v53, %v644_v57  ;;  %v530_v11 = vsel %vm513_vm5, %v481_v6, %v497_v8  ;;  %v658_v38 = vadd.f32 %v650_v56, %v2613_v15  ;;  %v258_v34 = vrot.slane %v2666_v13, 7 }
  0x6f   : > { %v2670_v40 = vadd.f32 %v440_v58, %v2648_v0  ;;  %v465_v43 = vadd.f32 %v437_v33, %v207_v54  ;;  %v546_v18 = vadd.f32 %v530_v11, %v514_v9  ;;  %v285_v57 = vrot.slane %v2659_v45, 1 }
  0x70   : > { %702 = vrot.lane.b32.xlu1 %v684_v46, %s2203_s12  ;;  %v297_v60 = vrot.slane %v2666_v13, 1  ;;  %v348_v35 = vrot.slane %v2659_v45, 6  ;;  %v350_v10 = vrot.slane %v2661_v55, 6  ;;  %v273_v62 = vsel %vm265_vm1, %v258_v34, %v246_v5 }
  0x71   : > { %v562_v41 = vadd.f32 %v546_v18, %v465_v43  ;;  %v618_v54 = vadd.f32 %v2531_v20, %v2670_v40  ;;  %v364_v63 = vrot.slane %v2666_v13, 6  ;;  %v366_v3 = vrot.slane %v2672_v19, 6 }
  0x72   : > { %v310_v1 = vsel %vm302_vm2, %v285_v57, %v297_v60  ;;  %v397_v4 = vrot.slane %v2659_v45, 2  ;;  %v399_v6 = vrot.slane %v2661_v55, 2  ;;  %v413_v33 = vrot.slane %v2666_v13, 2 }
  0x73   : > { %v626_v8 = vadd.f32 %v618_v54, %v2535_v21  ;;  %v666_v53 = vadd.f32 %v658_v38, %v562_v41  ;;  %v322_v31 = vadd.f32 %v310_v1, %v273_v62  ;;  %v381_v32 = vsel %vm371_vm3, %v364_v63, %v348_v35 }
  0x74   : > { %v383_v56 = vsel %vm371_vm3, %v366_v3, %v350_v10  ;;  %v415_v9 = vrot.slane %v2672_v19, 2  ;;  %v2698_v46 = vadd.f32 %v440_v58, %v2568_v52  ;;  %v2706_v38 = vadd.f32 %v2528_v7, %v2391_v39 }
  0x75   : > { %v634_v11 = vadd.f32 %v626_v8, %v453_v59  ;;  %v674_v5 = vadd.f32 %v666_v53, %v2616_v16  ;;  %v2702_v43 = vadd.f32 %v322_v31, %v2659_v45  ;;  %v430_v18 = vsel %vm420_vm4, %v397_v4, %v413_v33 }
  0x76   : > { %v432_v34 = vsel %vm420_vm4, %v399_v6, %v415_v9  ;;  %v484_v57 = vrot.slane %v2568_v52, 4  ;;  %v486_v58 = vrot.slane %v2391_v39, 4  ;;  %v446_v60 = vadd.f32 %v430_v18, %v381_v32  ;;  %v209_v32 = vld [vmem:[#allocation2 + $0x10] sm:$0xff] }
  0x77   : > { %v642_v59 = vadd.f32 %v634_v11, %v2545_v23  ;;  %v2715_v35 = vadd.f32 %v432_v34, %v383_v56  ;;  %v488_v10 = vrot.slane %v2400_v44, 4  ;;  %v490_v7 = vrot.slane %v2659_v45, 4  ;;  %v210_v56 = vld [vmem:[#allocation2 + $0x18] sm:$0xff] }
  0x78   : > { %v492_v41 = vrot.slane %v2661_v55, 4  ;;  %v500_v54 = vrot.slane %v2599_v61, 4  ;;  %v502_v62 = vrot.slane %v2358_v12, 4  ;;  %v2723_v52 = vadd.f32 %v446_v60, %v2702_v43 }
  0x79   : > { %v682_v63 = vadd.f32 %v674_v5, %v642_v59  ;;  %v2726_v39 = vadd.f32 %v446_v60, %v2659_v45  ;;  %v2730_v1 = vadd.f32 %v2715_v35, %v2661_v55  ;;  %v504_v44 = vrot.slane %v2362_v14, 4 }
  0x7a   : > { %v506_v3 = vrot.slane %v2666_v13, 4  ;;  %v508_v4 = vrot.slane %v2672_v19, 4  ;;  %v517_v12 = vsel %vm513_vm5, %v500_v54, %v484_v57  ;;  %v519_v61 = vsel %vm513_vm5, %v502_v62, %v486_v58 }
  0x7b   : > { %698 = vrot.lane.b32.xlu0 %v682_v63, %s2203_s12  ;;  %v533_v45 = vsel %vm513_vm5, %v484_v57, %v500_v54  ;;  %v535_v6 = vsel %vm513_vm5, %v486_v58, %v502_v62  ;;  %v621_v14 = vadd.f32 %v2548_v26, %v2545_v23  ;;  %v521_v13 = vsel %vm513_vm5, %v504_v44, %v488_v10 }
  0x7c   : > { %v523_v8 = vsel %vm513_vm5, %v506_v3, %v490_v7  ;;  %v525_v53 = vsel %vm513_vm5, %v508_v4, %v492_v41  ;;  %v537_v31 = vsel %vm513_vm5, %v488_v10, %v504_v44  ;;  %v539_v33 = vsel %vm513_vm5, %v490_v7, %v506_v3 }
  0x7d   : > { %v541_v9 = vsel %vm513_vm5, %v492_v41, %v508_v4  ;;  %v549_v11 = vadd.f32 %v533_v45, %v517_v12  ;;  %v551_v5 = vadd.f32 %v535_v6, %v519_v61  ;;  %v553_v18 = vadd.f32 %v537_v31, %v521_v13 }
  0x7e   : > { %v555_v34 = vadd.f32 %v539_v33, %v523_v8  ;;  %v557_v57 = vadd.f32 %v541_v9, %v525_v53  ;;  %v629_v58 = vadd.f32 %v621_v14, %v2551_v27  ;;  %v340_v10 = vrot.slane %v209_v32, 6 }
  0x7f   : > { %v565_v59 = vadd.f32 %v549_v11, %v2698_v46  ;;  %v2761_v60 = vadd.f32 %v551_v5, %v2706_v38  ;;  %v356_v54 = vrot.slane %v210_v56, 6  ;;  %v2764_v62 = vadd.f32 %v553_v18, %v2560_v48  ;;  %v2790_v5 = vld [vmem:[#allocation2 + $0xd0] sm:$0xff] }
  0x80   : > { %v2767_v7 = vadd.f32 %v555_v34, %v2726_v39  ;;  %v2770_v41 = vadd.f32 %v557_v57, %v2730_v1  ;;  %v637_v63 = vadd.f32 %v629_v58, %v2535_v21  ;;  %v389_v3 = vrot.slane %v209_v32, 2 }
  0x81   : > { %v373_v44 = vsel %vm371_vm3, %v356_v54, %v340_v10  ;;  %v405_v4 = vrot.slane %v210_v56, 2  ;;  %v482_v12 = vrot.slane %v209_v32, 4  ;;  %v653_v45 = vadd.f32 %v2764_v62, %v2761_v60 }
  0x82   : > { %v645_v61 = vadd.f32 %v637_v63, %v2723_v52  ;;  %v498_v6 = vrot.slane %v210_v56, 4  ;;  %v619_v14 = vadd.f32 %v2535_v21, %v2531_v20  ;;  %v651_v8 = vadd.f32 %v2761_v60, %v565_v59  ;;  %v2792_v20 = vld [vmem:[#allocation2 + $0xd8] sm:$0xff] }
  0x83   : > { %v422_v13 = vsel %vm420_vm4, %v389_v3, %v405_v4  ;;  %v248_v53 = vrot.slane %v2661_v55, 7  ;;  %v260_v31 = vrot.slane %v2672_v19, 7  ;;  %v661_v33 = vadd.f32 %v653_v45, %v2767_v7 }
  0x84   : > { %v438_v9 = vadd.f32 %v422_v13, %v373_v44  ;;  %v515_v11 = vsel %vm513_vm5, %v498_v6, %v482_v12  ;;  %v531_v56 = vsel %vm513_vm5, %v482_v12, %v498_v6  ;;  %v627_v18 = vadd.f32 %v619_v14, %v2545_v23 }
  0x85   : > { %v547_v21 = vadd.f32 %v531_v56, %v515_v11  ;;  %v659_v34 = vadd.f32 %v651_v8, %v2764_v62  ;;  %v275_v57 = vsel %vm265_vm1, %v260_v31, %v248_v53  ;;  %v669_v58 = vadd.f32 %v661_v33, %v565_v59  ;;  %v2812_v8 = vld [vmem:[#allocation2 + $0xc0] sm:$0xff] }
  0x86   : > { %v466_v10 = vadd.f32 %v438_v9, %v209_v32  ;;  %v287_v54 = vrot.slane %v2661_v55, 1  ;;  %v299_v63 = vrot.slane %v2672_v19, 1  ;;  %v635_v44 = vadd.f32 %v627_v18, %v2670_v40 }
  0x87   : > { %v352_v3 = vrot.slane %v2790_v5, 6  ;;  %v368_v4 = vrot.slane %v2792_v20, 6  ;;  %v401_v12 = vrot.slane %v2790_v5, 2  ;;  %v677_v45 = vadd.f32 %v669_v58, %v2770_v41 }
  0x88   : > { %v563_v6 = vadd.f32 %v547_v21, %v466_v10  ;;  %v312_v14 = vsel %vm302_vm2, %v287_v54, %v299_v63  ;;  %v417_v32 = vrot.slane %v2792_v20, 2  ;;  %v643_v59 = vadd.f32 %v635_v44, %v2548_v26 }
  0x89   : > { %v324_v13 = vadd.f32 %v312_v14, %v275_v57  ;;  %v385_v40 = vsel %vm371_vm3, %v368_v4, %v352_v3  ;;  %v494_v19 = vrot.slane %v2790_v5, 4  ;;  %v685_v53 = vadd.f32 %v677_v45, %v645_v61  ;;  %v232_v57 = vld [vmem:[#allocation2 + $0xc8] sm:$0xff] }
  0x8a   : > { %v667_v31 = vadd.f32 %v659_v34, %v563_v6  ;;  %v434_v33 = vsel %vm420_vm4, %v401_v12, %v417_v32  ;;  %v510_v9 = vrot.slane %v2792_v20, 4  ;;  %v623_v21 = vadd.f32 %v2723_v52, %v2551_v27 }
  0x8b   : > { %v2818_v11 = vadd.f32 %v324_v13, %v2661_v55  ;;  %v2820_v56 = vadd.f32 %v434_v33, %v385_v40  ;;  %v655_v18 = vadd.f32 %v2767_v7, %v2764_v62  ;;  %704 = vrot.lane.b32.xlu1 %v685_v53, %s2203_s12  ;;  %v351_v58 = vrot.slane %v2812_v8, 6 }
  0x8c   : > { %v675_v61 = vadd.f32 %v667_v31, %v2767_v7  ;;  %v527_v34 = vsel %vm513_vm5, %v510_v9, %v494_v19  ;;  %v543_v55 = vsel %vm513_vm5, %v494_v19, %v510_v9  ;;  %v631_v44 = vadd.f32 %v623_v21, %v2554_v37 }
  0x8d   : > { %v2835_v10 = vadd.f32 %v2715_v35, %v2818_v11  ;;  %v2839_v54 = vadd.f32 %v2820_v56, %v2790_v5  ;;  %v559_v63 = vadd.f32 %v543_v55, %v527_v34  ;;  %v663_v4 = vadd.f32 %v655_v18, %v2770_v41 }
  0x8e   : > { %v683_v3 = vadd.f32 %v675_v61, %v643_v59  ;;  %v367_v12 = vrot.slane %v232_v57, 6  ;;  %v400_v45 = vrot.slane %v2812_v8, 2  ;;  %v639_v14 = vadd.f32 %v631_v44, %v2548_v26 }
  0x8f   : > { %v2845_v6 = vadd.f32 %v559_v63, %v2839_v54  ;;  %v416_v35 = vrot.slane %v232_v57, 2  ;;  %v493_v32 = vrot.slane %v2812_v8, 4  ;;  %v671_v13 = vadd.f32 %v663_v4, %v2761_v60  ;;  %v238_v4 = vld [vmem:[#allocation2 + $0xf8] sm:$0xff] }
  0x90   : > { %700 = vrot.lane.b32.xlu0 %v683_v3, %s2203_s12  ;;  %v384_v59 = vsel %vm371_vm3, %v367_v12, %v351_v58  ;;  %v509_v40 = vrot.slane %v232_v57, 4  ;;  %v622_v19 = vadd.f32 %v2551_v27, %v2548_v26  ;;  %v647_v53 = vadd.f32 %v639_v14, %v2835_v10  ;;  %v237_v3 = vld [vmem:[#allocation2 + $0xf0] sm:$0xff] }
  0x91   : > { %v433_v31 = vsel %vm420_vm4, %v400_v45, %v416_v35  ;;  %v654_v33 = vadd.f32 %v2616_v16, %v2613_v15  ;;  %v249_v9 = vrot.slane %v2812_v8, 7  ;;  %v679_v21 = vadd.f32 %v671_v13, %v2845_v6 }
  0x92   : > { %v449_v60 = vadd.f32 %v433_v31, %v384_v59  ;;  %v526_v18 = vsel %vm513_vm5, %v509_v40, %v493_v32  ;;  %v542_v61 = vsel %vm513_vm5, %v493_v32, %v509_v40  ;;  %v630_v34 = vadd.f32 %v622_v19, %v2723_v52 }
  0x93   : > { %v558_v26 = vadd.f32 %v542_v61, %v526_v18  ;;  %v662_v55 = vadd.f32 %v654_v33, %v2619_v17  ;;  %v250_v58 = vrot.slane %v2790_v5, 7  ;;  %v687_v63 = vadd.f32 %v679_v21, %v647_v53 }
  0x94   : > { %v2870_v44 = vadd.f32 %v449_v60, %v2812_v8  ;;  %v261_v12 = vrot.slane %v232_v57, 7  ;;  %v262_v45 = vrot.slane %v2792_v20, 7  ;;  %v638_v14 = vadd.f32 %v630_v34, %v2545_v23 }
  0x95   : > { %v670_v35 = vadd.f32 %v662_v55, %v2608_v42  ;;  %v288_v32 = vrot.slane %v2812_v8, 1  ;;  %v289_v13 = vrot.slane %v2790_v5, 1  ;;  %708 = vrot.lane.b32.xlu1 %v687_v63, %s2203_s12  ;;  %v300_v53 = vrot.slane %v232_v57, 1 }
  0x96   : > { %v574_v59 = vadd.f32 %v558_v26, %v2870_v44  ;;  %v276_v40 = vsel %vm265_vm1, %v261_v12, %v249_v9  ;;  %v277_v19 = vsel %vm265_vm1, %v262_v45, %v250_v58  ;;  %v646_v31 = vadd.f32 %v638_v14, %v2554_v37  ;;  %v235_v58 = vld [vmem:[#allocation2 + $0xe0] sm:$0xff] }
  0x97   : > { %v301_v23 = vrot.slane %v2792_v20, 1  ;;  %v354_v42 = vrot.slane %v237_v3, 6  ;;  %v370_v33 = vrot.slane %v238_v4, 6  ;;  %v313_v18 = vsel %vm302_vm2, %v288_v32, %v300_v53 }
  0x98   : > { %v678_v21 = vadd.f32 %v670_v35, %v574_v59  ;;  %v403_v61 = vrot.slane %v237_v3, 2  ;;  %v419_v34 = vrot.slane %v238_v4, 2  ;;  %v325_v9 = vadd.f32 %v313_v18, %v276_v40  ;;  %v236_v40 = vld [vmem:[#allocation2 + $0xe8] sm:$0xff] }
  0x99   : > { %v314_v26 = vsel %vm302_vm2, %v289_v13, %v301_v23  ;;  %v387_v55 = vsel %vm371_vm3, %v370_v33, %v354_v42  ;;  %v496_v57 = vrot.slane %v237_v3, 4  ;;  %v512_v45 = vrot.slane %v238_v4, 4 }
  0x9a   : > { %v686_v63 = vadd.f32 %v678_v21, %v646_v31  ;;  %v326_v12 = vadd.f32 %v314_v26, %v277_v19  ;;  %v436_v20 = vsel %vm420_vm4, %v403_v61, %v419_v34  ;;  %v2894_v14 = vadd.f32 %v325_v9, %v2812_v8  ;;  %v2913_v9 = vld [vmem:[%s3212_s1] sm:$0xff] }
  0x9b   : > { %v452_v35 = vadd.f32 %v436_v20, %v387_v55  ;;  %v625_v32 = vadd.f32 %v2835_v10, %v2554_v37  ;;  %v657_v13 = vadd.f32 %v2770_v41, %v2767_v7  ;;  %v529_v19 = vsel %vm513_vm5, %v512_v45, %v496_v57 }
  0x9c   : > { %706 = vrot.lane.b32.xlu0 %v686_v63, %s2203_s12  ;;  %v338_v53 = vadd.f32 %v326_v12, %v2790_v5  ;;  %v545_v4 = vsel %vm513_vm5, %v496_v57, %v512_v45  ;;  %v353_v8 = vrot.slane %v235_v58, 6  ;;  %v463_v31 = vadd.f32 %v449_v60, %v2894_v14  ;;  %v2927_v12 = vld [vmem:[%s3212_s1 + $0x8] sm:$0xff] }
  0x9d   : > { %v480_v23 = vadd.f32 %v452_v35, %v237_v3  ;;  %v561_v42 = vadd.f32 %v545_v4, %v529_v19  ;;  %v665_v33 = vadd.f32 %v657_v13, %v2845_v6  ;;  %v369_v41 = vrot.slane %v236_v40, 6 }
  0x9e   : > { %v464_v7 = vadd.f32 %v2820_v56, %v338_v53  ;;  %v402_v21 = vrot.slane %v235_v58, 2  ;;  %v418_v18 = vrot.slane %v236_v40, 2  ;;  %v633_v5 = vadd.f32 %v625_v32, %v463_v31  ;;  %v732_v53 = vld [vmem:[%s3212_s1 + $0x10] sm:$0xff] }
  0x9f   : > { %v577_v61 = vadd.f32 %v561_v42, %v480_v23  ;;  %v673_v34 = vadd.f32 %v665_v33, %v2764_v62  ;;  %v495_v26 = vrot.slane %v235_v58, 4  ;;  %v386_v60 = vsel %vm371_vm3, %v369_v41, %v353_v8  ;;  %v736_v41 = vld [vmem:[%s3212_s1 + $0x30] sm:$0xff] }
  0xa0   : > { %v435_v6 = vsel %vm420_vm4, %v402_v21, %v418_v18  ;;  %v511_v56 = vrot.slane %v236_v40, 4  ;;  %v624_v3 = vadd.f32 %v2554_v37, %v2723_v52  ;;  %v641_v55 = vadd.f32 %v633_v5, %v2723_v52  ;;  %v737_v5 = vld [vmem:[%s3212_s1 + $0x38] sm:$0xff] }
  0xa1   : > { %v681_v57 = vadd.f32 %v673_v34, %v577_v61  ;;  %v451_v62 = vadd.f32 %v435_v6, %v386_v60  ;;  %v656_v63 = vadd.f32 %v2619_v17, %v2616_v16  ;;  %v764_v52 = vand.u32 4294901760, %v2913_v9 }
  0xa2   : > { %v528_v20 = vsel %vm513_vm5, %v511_v56, %v495_v26  ;;  %v544_v45 = vsel %vm513_vm5, %v495_v26, %v511_v56  ;;  %v632_v37 = vadd.f32 %v624_v3, %v2835_v10  ;;  %v649_v35 = vadd.f32 %v641_v55, %v464_v7  ;;  %v733_v10 = vld [vmem:[%s3212_s1 + $0x18] sm:$0xff] }
  0xa3   : > { %v479_v32 = vadd.f32 %v451_v62, %v235_v58  ;;  %v560_v13 = vadd.f32 %v544_v45, %v528_v20  ;;  %v664_v40 = vadd.f32 %v656_v63, %v574_v59  ;;  %v767_v17 = vand.u32 4294901760, %v2927_v12 }
  0xa4   : > { %v640_v16 = vadd.f32 %v632_v37, %v2551_v27  ;;  %v689_v19 = vadd.f32 %v681_v57, %v649_v35  ;;  %v734_v27 = vld [vmem:[%s3212_s1 + $0x20] sm:$0xff]  ;;  %v770_v23 = vand.u32 4294901760, %v732_v53  ;;  %v597_v42 = vadd.f32 %v2560_v48, %v2706_v38 }
  0xa5   : > { %v576_v4 = vadd.f32 %v560_v13, %v479_v32  ;;  %v672_v2 = vadd.f32 %v664_v40, %v2613_v15  ;;  %v2944_v58 = vpack.c.bf16 %v767_v17, %v764_v52  ;;  %v773_v15 = vand.u32 4294901760, %v733_v10 }
  0xa6   : > { %v648_v8 = vadd.f32 %v640_v16, %v463_v31  ;;  %712 = vrot.lane.b32.xlu1 %v689_v19, %s2203_s12  ;;  %v735_v31 = vld [vmem:[%s3212_s1 + $0x28] sm:$0xff]  ;;  %v776_v7 = vand.u32 4294901760, %v734_v27  ;;  %v2965_v18 = vadd.f32 %v597_v42, %v2726_v39  ;;  %v595_v61 = vadd.f32 %v2706_v38, %v2698_v46 }
  0xa7   : > { %v680_v59 = vadd.f32 %v672_v2, %v576_v4  ;;  %2003 = vmatprep.subr.bf16.mxu0 %v2944_v58  ;;  %1955 = vmatprep.subr.bf16.mxu1 %v2944_v58  ;;  %v2962_v21 = vpack.c.bf16 %v773_v15, %v770_v23  ;;  %v779_v34 = vand.u32 4294901760, %v735_v31  ;;  %v583_v26 = vadd.f32 %v2702_v43, %v2463_v30 }
  0xa8   : > { %2005 = vmatpush3.bf16.msra.mxu0 %v2944_v58  ;;  %1957 = vmatpush3.bf16.msra.mxu1 %v2944_v58  ;;  %v2978_v60 = vadd.f32 %v595_v61, %v2560_v48  ;;  %v599_v46 = vadd.f32 %v2726_v39, %v2560_v48  ;;  %v782_v38 = vand.u32 4294901760, %v736_v41  ;;  %v785_v3 = vand.u32 4294901760, %v737_v5 }
  0xa9   : > { %v688_v33 = vadd.f32 %v680_v59, %v648_v8  ;;  %2007 = vmatprep.subr.bf16.mxu0 %v2962_v21  ;;  %1959 = vmatprep.subr.bf16.mxu1 %v2962_v21  ;;  %v2984_v6 = vpack.c.bf16 %v779_v34, %v776_v7  ;;  %v591_v56 = vadd.f32 %v583_v26, %v2466_v36 }
  0xaa   : > { %v607_v55 = vadd.f32 %v599_v46, %v2730_v1  ;;  %v585_v57 = vadd.f32 %v2818_v11, %v2466_v36  ;;  %v2992_v48 = vpack.c.bf16 %v785_v3, %v782_v38  ;;  %v601_v62 = vadd.f32 %v2730_v1, %v2726_v39 }
  0xab   : > { %710 = vrot.lane.b32.xlu0 %v688_v33, %s2203_s12  ;;  %v584_v45 = vadd.f32 %v2466_v36, %v2702_v43  ;;  %v600_v35 = vadd.f32 %v2566_v51, %v2563_v49  ;;  %v918_v32 = vsub.f32 %v2913_v9, %v764_v52  ;;  %v925_v1 = vsub.f32 %v2927_v12, %v767_v17 }
  0xac   : > { %2009 = vmatpush3.bf16.msra.mxu0 %v2962_v21  ;;  %1961 = vmatpush3.bf16.msra.mxu1 %v2962_v21  ;;  %v2996_v63 = vadd.f32 %v607_v55, %v591_v56  ;;  %v593_v20 = vadd.f32 %v585_v57, %v2894_v14  ;;  %v609_v37 = vadd.f32 %v601_v62, %v2839_v54 }
  0xad   : > { %2011 = vmatprep.subr.bf16.mxu0 %v2984_v6  ;;  %1963 = vmatprep.subr.bf16.mxu1 %v2984_v6  ;;  %v592_v39 = vadd.f32 %v584_v45, %v2818_v11  ;;  %v608_v14 = vadd.f32 %v600_v35, %v2870_v44  ;;  %v919_v13 = vand.u32 4294901760, %v918_v32  ;;  %v932_v40 = vsub.f32 %v732_v53, %v770_v23 }
  0xae   : > { %v3011_v36 = vadd.f32 %v609_v37, %v593_v20  ;;  %v926_v54 = vand.u32 4294901760, %v925_v1  ;;  %v939_v16 = vsub.f32 %v733_v10, %v773_v15  ;;  %v946_v19 = vsub.f32 %v734_v27, %v776_v7 }
  0xaf   : > { %v953_v4 = vsub.f32 %v735_v31, %v779_v34  ;;  %v3015_v9 = vadd.f32 %v608_v14, %v592_v39  ;;  %v920_v52 = vsub.f32 %v918_v32, %v919_v13  ;;  %v933_v11 = vand.u32 4294901760, %v932_v40 }
  0xb0   : > { %2013 = vmatpush3.bf16.msra.mxu0 %v2984_v6  ;;  %1965 = vmatpush3.bf16.msra.mxu1 %v2984_v6  ;;  %v960_v2 = vsub.f32 %v736_v41, %v782_v38  ;;  %v3018_v12 = vpack.c.bf16 %v926_v54, %v919_v13  ;;  %v927_v17 = vsub.f32 %v925_v1, %v926_v54  ;;  %v940_v8 = vand.u32 4294901760, %v939_v16 }
  0xb1   : > { %2015 = vmatprep.subr.bf16.mxu0 %v2992_v48  ;;  %1967 = vmatprep.subr.bf16.mxu1 %v2992_v48  ;;  %v947_v44 = vand.u32 4294901760, %v946_v19  ;;  %v921_v59 = vand.u32 4294901760, %v920_v52  ;;  %v934_v53 = vsub.f32 %v932_v40, %v933_v11  ;;  %v954_v23 = vand.u32 4294901760, %v953_v4 }
  0xb2   : > { %v961_v10 = vand.u32 4294901760, %v960_v2  ;;  %v928_v27 = vand.u32 4294901760, %v927_v17  ;;  %v3021_v15 = vpack.c.bf16 %v940_v8, %v933_v11  ;;  %v941_v42 = vsub.f32 %v939_v16, %v940_v8 }
  0xb3   : > { %v948_v31 = vsub.f32 %v946_v19, %v947_v44  ;;  %v935_v33 = vand.u32 4294901760, %v934_v53  ;;  %v3023_v7 = vpack.c.bf16 %v954_v23, %v947_v44  ;;  %v955_v41 = vsub.f32 %v953_v4, %v954_v23 }
  0xb4   : > { %2017 = vmatpush3.bf16.msra.mxu0 %v2992_v48  ;;  %1969 = vmatpush3.bf16.msra.mxu1 %v2992_v48  ;;  %v967_v61 = vsub.f32 %v737_v5, %v785_v3  ;;  %v3025_v34 = vpack.c.bf16 %v928_v27, %v921_v59  ;;  %v942_v26 = vand.u32 4294901760, %v941_v42  ;;  %v962_v38 = vsub.f32 %v960_v2, %v961_v10 }
  0xb5   : > { %2019 = vmatprep.subr.bf16.mxu0 %v3018_v12  ;;  %v949_v46 = vand.u32 4294901760, %v948_v31  ;;  %v956_v56 = vand.u32 4294901760, %v955_v41  ;;  %v3027_v57 = vpack.c.bf16 %v925_v1, %v918_v32  ;;  %v3029_v62 = vpack.c.bf16 %v939_v16, %v932_v40 }
  0xb6   : > { %v968_v55 = vand.u32 4294901760, %v967_v61  ;;  %1971 = vmatprep.subr.bf16.mxu1 %v3025_v34  ;;  %v3032_v20 = vpack.c.bf16 %v942_v26, %v935_v33  ;;  %v3034_v45 = vpack.c.bf16 %v953_v4, %v946_v19  ;;  %v3036_v37 = vpack.c.bf16 %v967_v61, %v960_v2 }
  0xb7   : > { %v3038_v5 = vpack.c.bf16 %v956_v56, %v949_v46  ;;  %v963_v35 = vand.u32 4294901760, %v962_v38  ;;  %v578_v32 = vadd.f32 %v2449_v24, %v2648_v0  ;;  %v594_v1 = vadd.f32 %v2542_v50, %v2539_v22 }
  0xb8   : > { %v3040_v3 = vpack.c.bf16 %v968_v55, %v961_v10  ;;  %v969_v39 = vsub.f32 %v967_v61, %v968_v55  ;;  %v580_v19 = vadd.f32 %v2457_v28, %v2452_v25  ;;  %v596_v4 = vadd.f32 %v2557_v47, %v2542_v50 }
  0xb9   : > { %v586_v40 = vadd.f32 %v578_v32, %v2452_v25  ;;  %v602_v54 = vadd.f32 %v594_v1, %v2557_v47  ;;  %v581_v44 = vadd.f32 %v2460_v29, %v2457_v28  ;;  %v579_v27 = vadd.f32 %v2452_v25, %v2449_v24 }
  0xba   : > { %v970_v14 = vand.u32 4294901760, %v969_v39  ;;  %v588_v2 = vadd.f32 %v580_v19, %v2460_v29  ;;  %v604_v22 = vadd.f32 %v596_v4, %v2563_v49 }
  0xbb   : > { %v610_v16 = vadd.f32 %v602_v54, %v586_v40  ;;  %v589_v10 = vadd.f32 %v581_v44, %v2463_v30  ;;  %v587_v61 = vadd.f32 %v579_v27, %v2457_v28  ;;  %v582_v28 = vadd.f32 %v2463_v30, %v2460_v29 }
  0xbc   : > { %v3042_v13 = vpack.c.bf16 %v970_v14, %v963_v35  ;;  %v612_v59 = vadd.f32 %v604_v22, %v588_v2 }
  0xbd   : > { %v613_v41 = vadd.f32 %v2965_v18, %v589_v10  ;;  %v611_v56 = vadd.f32 %v2978_v60, %v587_v61  ;;  %v598_v18 = vadd.f32 %v2563_v49, %v2557_v47  ;;  %v590_v54 = vadd.f32 %v582_v28, %v2702_v43 }
  0xe2   : > { %v703_v53 = vpop.permute.xlu1 %702 }
  0xe3   : > { %v724_v42 = vsel %vm164_vm0, %v612_v59, %v703_v53 }
  0xe4   : > { %v746_v33 = vsel %vm738_vm6, %v724_v42, 0 }
  0xe5   : > { %v3074_v26 = vand.u32 4294901760, %v746_v33 }
  0xe7   : > { %v3082_v25 = vsub.f32 %v746_v33, %v3074_v26 }
  0xe9   : > { %v858_v1 = vand.u32 4294901760, %v3082_v25 }
  0xeb   : > { %v859_v4 = vsub.f32 %v3082_v25, %v858_v1 }
  0xed   : > { %v699_v52 = vpop.permute.xlu0 %698  ;;  %v860_v22 = vand.u32 4294901760, %v859_v4 }
  0xee   : > { %v722_v11 = vsel %vm164_vm0, %v610_v16, %v699_v52  ;;  %v606_v16 = vadd.f32 %v598_v18, %v2566_v51 }
  0xef   : > { %v740_v0 = vsel %vm738_vm6, %v722_v11, 0 }
  0xf0   : > { %v3058_v17 = vand.u32 4294901760, %v740_v0  ;;  %v614_v11 = vadd.f32 %v606_v16, %v590_v54 }
  0xf2   : > { %v3061_v8 = vsub.f32 %v740_v0, %v3058_v17 }
  0xf4   : > { %v838_v50 = vand.u32 4294901760, %v3061_v8 }
  0xf6   : > { %1886 = vmatprep.mubr.f32.mxu0 %v838_v50  ;;  %v839_v23 = vsub.f32 %v3061_v8, %v838_v50 }
  0xf8   : > { %v840_v31 = vand.u32 4294901760, %v839_v23 }
  0xfa   : > { %1802 = vmatprep.mubr.f32.mxu1 %v840_v31 }
  0xfd   : > { %v705_v46 = vpop.permute.xlu1 %704 }
  0xfe   : > { %v725_v38 = vsel %vm164_vm0, %v613_v41, %v705_v46 }
  0xff   : > { %v749_v55 = vsel %vm738_vm6, %v725_v38, 0 }
 0x100   : > { %v3079_v24 = vand.u32 4294901760, %v749_v55 }
 0x102   : > { %v701_v35 = vpop.permute.xlu0 %700  ;;  %v3091_v60 = vsub.f32 %v749_v55, %v3079_v24 }
 0x103   : > { %v723_v39 = vsel %vm164_vm0, %v611_v56, %v701_v35 }
 0x104   : > { %v743_v14 = vsel %vm738_vm6, %v723_v39, 0  ;;  %v868_v49 = vand.u32 4294901760, %v3091_v60 }
 0x105   : > { %v3093_v32 = vand.u32 4294901760, %v743_v14 }
 0x107   : > { %v3097_v40 = vsub.f32 %v743_v14, %v3093_v32  ;;  %v709_v29 = vpop.permute.xlu1 %708 }
 0x108   : > { %v727_v30 = vsel %vm164_vm0, %v2996_v63, %v709_v29  ;;  %v869_v63 = vsub.f32 %v3091_v60, %v868_v49 }
 0x109   : > { %v848_v47 = vand.u32 4294901760, %v3097_v40  ;;  %v755_v19 = vsel %vm738_vm6, %v727_v30, 0 }
 0x10a   : > { %v3107_v52 = vand.u32 4294901760, %v755_v19  ;;  %v870_v50 = vand.u32 4294901760, %v869_v63 }
 0x10b   : > { %1887 = vmatmul.mubr.f32.vlgmr.msra.gmra.mrb[0].mxu0 %v848_v47  ;;  %v849_v43 = vsub.f32 %v3097_v40, %v848_v47 }
 0x10c   : > { %1889 = vmatprep.mubr.f32.mxu0 %v858_v1  ;;  %2021 = vmatpush3.bf16.msra.mxu0 %v3018_v12  ;;  %v3114_v0 = vsub.f32 %v755_v19, %v3107_v52 }
 0x10d   : > { %v850_v51 = vand.u32 4294901760, %v849_v43  ;;  %2023 = vmatprep.subr.bf16.mxu0 %v3021_v15 }
 0x10e   : > { %v707_v2 = vpop.permute.xlu0 %706  ;;  %v888_v53 = vand.u32 4294901760, %v3114_v0 }
 0x10f   : > { %v726_v44 = vsel %vm164_vm0, %v614_v11, %v707_v2  ;;  %1803 = vmatmul.mubr.f32.vlgmr.msra.gmra.mrb[0].mxu1 %v850_v51  ;;  %1890 = vmatmul.mubr.f32.gmra.mrb[2].mxu0 %v868_v49 }
 0x110   : > { %v752_v59 = vsel %vm738_vm6, %v726_v44, 0  ;;  %1973 = vmatpush3.bf16.msra.mxu1 %v3025_v34  ;;  %1805 = vmatprep.mubr.f32.mxu1 %v860_v22 }
 0x111   : > { %v3119_v12 = vand.u32 4294901760, %v752_v59  ;;  %2025 = vmatpush3.bf16.msra.mxu0 %v3021_v15  ;;  %1975 = vmatprep.subr.bf16.mxu1 %v3032_v20  ;;  %v889_v15 = vsub.f32 %v3114_v0, %v888_v53 }
 0x112   : > { %2027 = vmatprep.subr.bf16.mxu0 %v3023_v7 }
 0x113   : > { %v3126_v23 = vsub.f32 %v752_v59, %v3119_v12  ;;  %1806 = vmatmul.mubr.f32.gmra.mrb[2].mxu1 %v870_v50 }
 0x114   : > { %1977 = vmatpush3.bf16.msra.mxu1 %v3032_v20  ;;  %v890_v20 = vand.u32 4294901760, %v889_v15 }
 0x115   : > { %v878_v34 = vand.u32 4294901760, %v3126_v23  ;;  %2029 = vmatpush3.bf16.msra.mxu0 %v3023_v7  ;;  %1979 = vmatprep.subr.bf16.mxu1 %v3038_v5 }
 0x116   : > { %2031 = vmatprep.subr.bf16.mxu0 %v3040_v3 }
 0x117   : > { %1892 = vmatprep.mubr.f32.mxu0 %v878_v34  ;;  %v879_v10 = vsub.f32 %v3126_v23, %v878_v34 }
 0x118   : > { %1893 = vmatmul.mubr.f32.gmra.mrb[4].mxu0 %v888_v53  ;;  %1981 = vmatpush3.bf16.msra.mxu1 %v3038_v5  ;;  %v713_v27 = vpop.permute.xlu1 %712 }
 0x119   : > { %v880_v42 = vand.u32 4294901760, %v879_v10  ;;  %2033 = vmatpush3.bf16.msra.mxu0 %v3040_v3  ;;  %1983 = vmatprep.subr.bf16.mxu1 %v3042_v13  ;;  %v729_v7 = vsel %vm164_vm0, %v3011_v36, %v713_v27 }
 0x11a   : > { %2035 = vmatprep.subr.bf16.mxu0 %v2944_v58  ;;  %v761_v31 = vsel %vm738_vm6, %v729_v7, 0 }
 0x11b   : > { %1808 = vmatprep.mubr.f32.mxu1 %v880_v42  ;;  %v906_v33 = vand.u32 4294901760, %v761_v31 }
 0x11c   : > { %1809 = vmatmul.mubr.f32.gmra.mrb[4].mxu1 %v890_v20 }
 0x11d   : > { %v711_v41 = vpop.permute.xlu0 %710  ;;  %1985 = vmatpush3.bf16.msra.mxu1 %v3042_v13  ;;  %v907_v5 = vsub.f32 %v761_v31, %v906_v33 }
 0x11e   : > { %v728_v3 = vsel %vm164_vm0, %v3015_v9, %v711_v41  ;;  %1987 = vmatprep.subr.bf16.mxu1 %v3027_v57 }
 0x11f   : > { %v758_v61 = vsel %vm738_vm6, %v728_v3, 0  ;;  %v908_v46 = vand.u32 4294901760, %v907_v5 }
 0x120   : > { %v896_v36 = vand.u32 4294901760, %v758_v61 }
 0x121   : > { %v909_v55 = vsub.f32 %v907_v5, %v908_v46 }
 0x122   : > { %v897_v38 = vsub.f32 %v758_v61, %v896_v36 }
 0x123   : > { %v910_v13 = vand.u32 4294901760, %v909_v55 }
 0x124   : > { %v898_v56 = vand.u32 4294901760, %v897_v38 }
 0x126   : > { %1895 = vmatprep.mubr.f32.mxu0 %v898_v56  ;;  %v899_v35 = vsub.f32 %v897_v38, %v898_v56 }
 0x127   : > { %1896 = vmatmul.mubr.f32.gmra.mrb[6].mxu0 %v908_v46 }
 0x128   : > { %v900_v39 = vand.u32 4294901760, %v899_v35  ;;  %1914 = vmatprep.mubr.f32.mxu0 %v3058_v17 }
 0x12a   : > { %1811 = vmatprep.mubr.f32.mxu1 %v900_v39 }
 0x12b   : > { %1812 = vmatmul.mubr.f32.gmra.mrb[6].mxu1 %v910_v13  ;;  %1915 = vmatmul.mubr.f32.vlgmr.msra.gmra.mrb[0].mxu0 %v3093_v32 }
 0x12c   : > { %1830 = vmatprep.mubr.f32.mxu1 %v3058_v17  ;;  %1917 = vmatprep.mubr.f32.mxu0 %v3074_v26 }
 0x12d   : > { %2037 = vmatpush3.bf16.msra.mxu0 %v2944_v58 }
 0x12e   : > { %2039 = vmatprep.subr.bf16.mxu0 %v2962_v21 }
 0x12f   : > { %1831 = vmatmul.mubr.f32.vlgmr.msra.gmra.mrb[0].mxu1 %v3093_v32  ;;  %1918 = vmatmul.mubr.f32.gmra.mrb[2].mxu0 %v3079_v24 }
 0x130   : > { %1989 = vmatpush3.bf16.msra.mxu1 %v3027_v57  ;;  %1833 = vmatprep.mubr.f32.mxu1 %v3074_v26 }
 0x131   : > { %1920 = vmatprep.mubr.f32.mxu0 %v3119_v12  ;;  %2041 = vmatpush3.bf16.msra.mxu0 %v2962_v21 }
 0x132   : > { %1991 = vmatprep.subr.bf16.mxu1 %v3029_v62  ;;  %2043 = vmatprep.subr.bf16.mxu0 %v2984_v6 }
 0x133   : > { %1834 = vmatmul.mubr.f32.gmra.mrb[2].mxu1 %v3079_v24  ;;  %1921 = vmatmul.mubr.f32.gmra.mrb[4].mxu0 %v3107_v52 }
 0x134   : > { %1993 = vmatpush3.bf16.msra.mxu1 %v3029_v62  ;;  %1836 = vmatprep.mubr.f32.mxu1 %v3119_v12 }
 0x135   : > { %1923 = vmatprep.mubr.f32.mxu0 %v896_v36  ;;  %2045 = vmatpush3.bf16.msra.mxu0 %v2984_v6 }
 0x136   : > { %1995 = vmatprep.subr.bf16.mxu1 %v3034_v45  ;;  %2047 = vmatprep.subr.bf16.mxu0 %v2992_v48 }
 0x137   : > { %1837 = vmatmul.mubr.f32.gmra.mrb[4].mxu1 %v3107_v52  ;;  %1924 = vmatmul.mubr.f32.gmra.mrb[6].mxu0 %v906_v33 }
 0x138   : > { %1997 = vmatpush3.bf16.msra.mxu1 %v3034_v45  ;;  %1839 = vmatprep.mubr.f32.mxu1 %v896_v36 }
 0x139   : > { %2049 = vmatpush3.bf16.msra.mxu0 %v2992_v48  ;;  %1942 = vmatprep.mubr.f32.mxu0 %v3058_v17 }
 0x13a   : > { %1999 = vmatprep.subr.bf16.mxu1 %v3036_v37 }
 0x13b   : > { %1840 = vmatmul.mubr.f32.gmra.mrb[6].mxu1 %v906_v33 }
 0x13c   : > { %2001 = vmatpush3.bf16.msra.mxu1 %v3036_v37  ;;  %1943 = vmatmul.mubr.f32.vlgmr.msra.gmra.mrb[0].mxu0 %v3093_v32 }
 0x13d   : > { %1858 = vmatprep.mubr.f32.mxu1 %v3061_v8  ;;  %1945 = vmatprep.mubr.f32.mxu0 %v3074_v26 }
 0x13f   : > { %1859 = vmatmul.mubr.f32.vlgmr.msra.gmra.mrb[0].mxu1 %v3097_v40 }
 0x140   : > { %1946 = vmatmul.mubr.f32.gmra.mrb[2].mxu0 %v3079_v24  ;;  %1861 = vmatprep.mubr.f32.mxu1 %v3082_v25 }
 0x141   : > { %1948 = vmatprep.mubr.f32.mxu0 %v3119_v12 }
 0x143   : > { %1862 = vmatmul.mubr.f32.gmra.mrb[2].mxu1 %v3091_v60 }
 0x144   : > { %1949 = vmatmul.mubr.f32.gmra.mrb[4].mxu0 %v3107_v52  ;;  %1864 = vmatprep.mubr.f32.mxu1 %v3126_v23 }
 0x145   : > { %1951 = vmatprep.mubr.f32.mxu0 %v896_v36 }
 0x147   : > { %1865 = vmatmul.mubr.f32.gmra.mrb[4].mxu1 %v3114_v0 }
 0x148   : > { %1952 = vmatmul.mubr.f32.gmra.mrb[6].mxu0 %v906_v33  ;;  %1867 = vmatprep.mubr.f32.mxu1 %v897_v38 }
 0x14b   : > { %1868 = vmatmul.mubr.f32.gmra.mrb[6].mxu1 %v907_v5 }
 0x20f   : > { %v1944_v58 = vpop.f32.mrb[0].mxu0 }
 0x210   : > { %v1555_v21 = vpop.f32.mrb[1].mxu0 }
 0x212   : > { %v1860_v6 = vpop.f32.mrb[0].mxu1 }
 0x213   : > { %v2050_v48 = vadd.f32 %v1944_v58, %v1860_v6  ;;  %v1947_v9 = vpop.f32.mrb[2].mxu0  ;;  %v1153_v57 = vpop.f32.mrb[1].mxu1 }
 0x214   : > { %v2051_v62 = vadd.f32 %v1555_v21, %v1153_v57  ;;  %v1567_v45 = vpop.f32.mrb[3].mxu0 }
 0x215   : > { %1602 = vst.msk [vmem:[%s163_s21 + $0x8] sm:$0xff] %vm164_vm0, %v2050_v48 }
 0x216   : > { %1601 = vst.msk [vmem:[%s163_s21] sm:$0xff] %vm164_vm0, %v2051_v62  ;;  %v1863_v37 = vpop.f32.mrb[2].mxu1 }
 0x217   : > { %v2052_v17 = vadd.f32 %v1947_v9, %v1863_v37  ;;  %v1950_v8 = vpop.f32.mrb[4].mxu0  ;;  %v1167_v26 = vpop.f32.mrb[3].mxu1 }
 0x218   : > { %v2053_v24 = vadd.f32 %v1567_v45, %v1167_v26  ;;  %v1579_v25 = vpop.f32.mrb[5].mxu0 }
 0x219   : > { %1604 = vst.msk [vmem:[%s163_s21 + $0x18] sm:$0xff] %vm164_vm0, %v2052_v17 }
 0x21a   : > { %1603 = vst.msk [vmem:[%s163_s21 + $0x10] sm:$0xff] %vm164_vm0, %v2053_v24  ;;  %v1866_v28 = vpop.f32.mrb[4].mxu1 }
 0x21b   : > { %v2054_v18 = vadd.f32 %v1950_v8, %v1866_v28  ;;  %v1953_v14 = vpop.f32.mrb[6].mxu0  ;;  %v1181_v60 = vpop.f32.mrb[5].mxu1 }
 0x21c   : > { %v2055_v32 = vadd.f32 %v1579_v25, %v1181_v60  ;;  %v1591_v1 = vpop.f32.mrb[7].mxu0 }
 0x21d   : > { %1606 = vst.msk [vmem:[%s163_s21 + $0x28] sm:$0xff] %vm164_vm0, %v2054_v18 }
 0x21e   : > { %1605 = vst.msk [vmem:[%s163_s21 + $0x20] sm:$0xff] %vm164_vm0, %v2055_v32  ;;  %v1869_v40 = vpop.f32.mrb[6].mxu1 }
 0x21f   : > { %v2056_v54 = vadd.f32 %v1953_v14, %v1869_v40  ;;  %v1195_v16 = vpop.f32.mrb[7].mxu1 }
 0x220   : > { %v2057_v29 = vadd.f32 %v1591_v1, %v1195_v16 }
 0x221   : > { %1608 = vst.msk [vmem:[%s163_s21 + $0x38] sm:$0xff] %vm164_vm0, %v2056_v54 }
 0x222   : > { %1607 = vst.msk [vmem:[%s163_s21 + $0x30] sm:$0xff] %vm164_vm0, %v2057_v29 }
 0x223 PF: > { %p12_p8 = scmp.ge.s32.totalorder %s2241_s14, 4   ;;  %s3217_s9 = smov %s2189_s10 }
 0x224   : > { %s3218_s10 = smov %s2193_s11  ;;  %s3219_s11 = smov %s2251_s17 }
 0x225   : > { %s3220_s12 = smov %s2241_s14  ;;  %14 = sbr.rel (!%p12_p8) target bundleno = 3 (0x3), region = 70 }
 0x22c   :  { %1630 = vsyncpa [#allocation4], 1 }
 0x22d   :  { %1632 = vsyncpa [#allocation4 + $0x1], 1 }

</bundles_post_ra>
